<compile_context>
chip_gen: v6e
topology: v6e:2x2x1
jax: 0.10.0
libtpu: 0.0.40
codegen_flags: <defaults>
</compile_context>

<pallas_src>
import jax
import jax.numpy as jnp
from jax.experimental import pallas as pl
from jax.experimental.pallas import tpu as pltpu


def _round_up(x: int, m: int) -> int:
    return ((x + m - 1) // m) * m


def _linear_block_kernel(x_ref, w_ref, b_ref, o_ref, acc_ref):
    # x_ref: (tm, tk) bf16, w_ref: (tk, tn) bf16, b_ref: (1, tn) f32,
    # o_ref: (tm, tn) out dtype, acc_ref: (tm, tn) f32 scratch (resident over K).
    k = pl.program_id(2)

    @pl.when(k == 0)
    def _():
        acc_ref[...] = jnp.zeros_like(acc_ref)

    acc_ref[...] += jnp.dot(
        x_ref[...], w_ref[...], preferred_element_type=jnp.float32
    )

    @pl.when(k == pl.num_programs(2) - 1)
    def _():
        y = acc_ref[...] + b_ref[...]          # bias broadcast over rows (f32)
        o_ref[...] = jnp.maximum(y, 0.0).astype(o_ref.dtype)   # ReLU epilogue
    # TODO(synk): nn.Dropout training-mode stochastic masking not implemented;
    # eval-mode dropout is identity, which is what this kernel reproduces.


def linear_block(x, w_t, b, *, tm=256, tn=512, tk=512,
                 compute_dtype=jnp.bfloat16):
    """ReLU(x @ w_t + b).

    x:   [B, c_in]
    w_t: [c_in, c_out]   (PyTorch nn.Linear weight, transposed)
    b:   [c_out]
    """
    B, c_in = x.shape
    c_out = w_t.shape[1]
    out_dtype = x.dtype

    # Shrink tiles to the (hardware-aligned) padded problem for small shapes,
    # keep them MXU/lane friendly: tm multiple of 8, tk/tn multiples of 128.
    tm = min(tm, _round_up(B, 8))
    tk = min(tk, _round_up(c_in, 128))
    tn = min(tn, _round_up(c_out, 128))

    B_p = _round_up(B, tm)
    K_p = _round_up(c_in, tk)
    N_p = _round_up(c_out, tn)

    # Zero padding is exact: padded K rows/cols contribute 0 to the dot, padded
    # N columns (zero weight + zero bias) are dropped by the final slice.
    xp = jnp.zeros((B_p, K_p), compute_dtype).at[:B, :c_in].set(
        x.astype(compute_dtype))
    wp = jnp.zeros((K_p, N_p), compute_dtype).at[:c_in, :c_out].set(
        w_t.astype(compute_dtype))
    bp = jnp.zeros((1, N_p), jnp.float32).at[0, :c_out].set(
        b.astype(jnp.float32))

    grid = (B_p // tm, N_p // tn, K_p // tk)

    out = pl.pallas_call(
        _linear_block_kernel,
        out_shape=jax.ShapeDtypeStruct((B_p, N_p), out_dtype),
        grid_spec=pltpu.PrefetchScalarGridSpec(
            num_scalar_prefetch=0,
            grid=grid,
            in_specs=[
                pl.BlockSpec((tm, tk), lambda i, j, k: (i, k)),   # x
                pl.BlockSpec((tk, tn), lambda i, j, k: (k, j)),   # w_t
                pl.BlockSpec((1, tn), lambda i, j, k: (0, j)),    # bias
            ],
            out_specs=pl.BlockSpec((tm, tn), lambda i, j, k: (i, j)),
            scratch_shapes=[pltpu.VMEM((tm, tn), jnp.float32)],
        ),
        compiler_params=pltpu.CompilerParams(
            dimension_semantics=("parallel", "parallel", "arbitrary"),
            vmem_limit_bytes=48 * 1024 * 1024,   # headroom on v7x, large on v5e/v6e
        ),
    )(xp, wp, bp)

    return out[:B, :c_out]


def reference(x, w_t, b, compute_dtype=jnp.bfloat16):
    acc = jnp.dot(x.astype(compute_dtype), w_t.astype(compute_dtype),
                  preferred_element_type=jnp.float32)
    return jnp.maximum(acc + b[None, :].astype(jnp.float32), 0.0).astype(x.dtype)


if __name__ == "__main__":
    key = jax.random.PRNGKey(0)
    k1, k2, k3, k4, k5, k6 = jax.random.split(key, 6)

    # --- Test 1: module-sized shapes (single-tile path after padding) ---
    B, c_in, c_out = 8, 32, 64
    x = jax.random.normal(k1, (B, c_in), dtype=jnp.float32)
    bound = 1.0 / jnp.sqrt(jnp.float32(c_in))
    w = jax.random.uniform(k2, (c_out, c_in), minval=-bound, maxval=bound,
                           dtype=jnp.float32)          # PyTorch layout [c_out, c_in]
    b = jax.random.uniform(k3, (c_out,), minval=-bound, maxval=bound,
                           dtype=jnp.float32)

    out = jax.block_until_ready(linear_block(x, w.T, b))
    ref = reference(x, w.T, b)
    assert out.shape == (B, c_out)
    assert jnp.allclose(out, ref, atol=1e-3, rtol=1e-3)

    # --- Test 2: multi-tile grid (exercises K accumulator + parallel M/N axes) ---
    B2, ci2, co2 = 16, 256, 384
    x2 = jax.random.normal(k4, (B2, ci2), dtype=jnp.float32)
    bound2 = 1.0 / jnp.sqrt(jnp.float32(ci2))
    w2 = jax.random.uniform(k5, (co2, ci2), minval=-bound2, maxval=bound2,
                            dtype=jnp.float32)
    b2 = jax.random.uniform(k6, (co2,), minval=-bound2, maxval=bound2,
                            dtype=jnp.float32)

    out2 = jax.block_until_ready(linear_block(x2, w2.T, b2, tm=8, tn=128, tk=128))
    ref2 = reference(x2, w2.T, b2)
    assert out2.shape == (B2, co2)
    assert jnp.allclose(out2, ref2, atol=2e-3, rtol=2e-3)

    print("KERNEL_OK")
</pallas_src>

<mosaic_0001>
module attributes {stable_mosaic.version = 11 : i64} {
  func.func @_linear_block_kernel(%arg0: i32, %arg1: i32, %arg2: i32, %arg3: memref<8x128xbf16, #tpu.memory_space<vmem>>, %arg4: memref<128x128xbf16, #tpu.memory_space<vmem>>, %arg5: memref<1x128xf32, #tpu.memory_space<vmem>>, %arg6: memref<8x128xf32, #tpu.memory_space<vmem>>, %arg7: memref<8x128xf32, #tpu.memory_space<vmem>>) attributes {dimension_semantics = [#tpu.dimension_semantics<parallel>, #tpu.dimension_semantics<parallel>, #tpu.dimension_semantics<arbitrary>], iteration_bounds = array<i64: 1, 1, 1>, scalar_prefetch = 0 : i64, scratch_operands = 1 : i64, tpu.core_type = #tpu.core_type<tc>, window_params = [{transform_indices = @transform_0, window_bounds = array<i64: 8, 128>}, {transform_indices = @transform_1, window_bounds = array<i64: 128, 128>}, {transform_indices = @transform_2, window_bounds = array<i64: 1, 128>}, {transform_indices = @transform_3, window_bounds = array<i64: 8, 128>}]} {
    %c0_i32 = arith.constant 0 : i32
    %0 = arith.cmpi eq, %arg2, %c0_i32 : i32
    %1 = arith.extui %0 : i1 to i32
    %c0_i32_0 = arith.constant 0 : i32
    %2 = arith.cmpi ne, %1, %c0_i32_0 : i32
    scf.if %2 {
      %cst_10 = arith.constant 0.000000e+00 : f32
      %12 = vector.broadcast %cst_10 : f32 to vector<8x128xf32>
      %c0_11 = arith.constant 0 : index
      %c0_12 = arith.constant 0 : index
      %13 = vector.load %arg7[%c0_11, %c0_12] : memref<8x128xf32, #tpu.memory_space<vmem>>, vector<8x128xf32>
      tpu.vector_store %arg7[%c0_11, %c0_12], %12 {strides = array<i32>} : memref<8x128xf32, #tpu.memory_space<vmem>>, vector<8x128xf32>,
    } else {
    }
    %c0 = arith.constant 0 : index
    %c0_1 = arith.constant 0 : index
    %3 = vector.load %arg7[%c0, %c0_1] : memref<8x128xf32, #tpu.memory_space<vmem>>, vector<8x128xf32>
    %c0_2 = arith.constant 0 : index
    %c0_3 = arith.constant 0 : index
    %4 = vector.load %arg3[%c0_2, %c0_3] : memref<8x128xbf16, #tpu.memory_space<vmem>>, vector<8x128xbf16>
    %c0_4 = arith.constant 0 : index
    %c0_5 = arith.constant 0 : index
    %5 = vector.load %arg4[%c0_4, %c0_5] : memref<128x128xbf16, #tpu.memory_space<vmem>>, vector<128x128xbf16>
    %cst = arith.constant dense<0.000000e+00> : vector<8x128xf32>
    %6 = tpu.matmul %4, %5, %cst {dimension_numbers = #tpu.dot_dimension_numbers<[1], [0], [0], [1], [0, 0, 1, 1], [], []>} : vector<8x128xbf16>, vector<128x128xbf16>, vector<8x128xf32> -> vector<8x128xf32>
    %7 = arith.addf %3, %6 : vector<8x128xf32>
    %c0_6 = arith.constant 0 : index
    %c0_7 = arith.constant 0 : index
    %8 = vector.load %arg7[%c0_6, %c0_7] : memref<8x128xf32, #tpu.memory_space<vmem>>, vector<8x128xf32>
    tpu.vector_store %arg7[%c0_6, %c0_7], %7 {strides = array<i32>} : memref<8x128xf32, #tpu.memory_space<vmem>>, vector<8x128xf32>,
    %c0_i32_8 = arith.constant 0 : i32
    %9 = arith.cmpi eq, %arg2, %c0_i32_8 : i32
    %10 = arith.extui %9 : i1 to i32
    %c0_i32_9 = arith.constant 0 : i32
    %11 = arith.cmpi ne, %10, %c0_i32_9 : i32
    scf.if %11 {
      %c0_10 = arith.constant 0 : index
      %c0_11 = arith.constant 0 : index
      %12 = vector.load %arg7[%c0_10, %c0_11] : memref<8x128xf32, #tpu.memory_space<vmem>>, vector<8x128xf32>
      %c0_12 = arith.constant 0 : index
      %c0_13 = arith.constant 0 : index
      %13 = vector.load %arg5[%c0_12, %c0_13] : memref<1x128xf32, #tpu.memory_space<vmem>>, vector<1x128xf32>
      %14 = vector.broadcast %13 : vector<1x128xf32> to vector<8x128xf32>
      %15 = arith.addf %12, %14 : vector<8x128xf32>
      %cst_14 = arith.constant 0.000000e+00 : f32
      %16 = vector.broadcast %cst_14 : f32 to vector<8x128xf32>
      %17 = arith.maximumf %15, %16 : vector<8x128xf32>
      %c0_15 = arith.constant 0 : index
      %c0_16 = arith.constant 0 : index
      %18 = vector.load %arg6[%c0_15, %c0_16] : memref<8x128xf32, #tpu.memory_space<vmem>>, vector<8x128xf32>
      tpu.vector_store %arg6[%c0_15, %c0_16], %17 {strides = array<i32>} : memref<8x128xf32, #tpu.memory_space<vmem>>, vector<8x128xf32>,
    } else {
    }
    return
  }
  func.func @transform_0(%arg0: i32, %arg1: i32, %arg2: i32) -> (i32, i32) {
    %c0_i32 = arith.constant 0 : i32
    return %arg0, %arg2 : i32, i32
  }
  func.func @transform_1(%arg0: i32, %arg1: i32, %arg2: i32) -> (i32, i32) {
    %c0_i32 = arith.constant 0 : i32
    return %arg2, %arg1 : i32, i32
  }
  func.func @transform_2(%arg0: i32, %arg1: i32, %arg2: i32) -> (i32, i32) {
    %c0_i32 = arith.constant 0 : i32
    %c0_i32_0 = arith.constant 0 : i32
    return %c0_i32, %arg1 : i32, i32
  }
  func.func @transform_3(%arg0: i32, %arg1: i32, %arg2: i32) -> (i32, i32) {
    %c0_i32 = arith.constant 0 : i32
    return %arg0, %arg1 : i32, i32
  }
}

</mosaic_0001>

<bundles_post_ra>
// kernel: tpu_custom_call.1
= control target key start
LH: loop header
LB: loop body
LE: loop exit
PB: predicated region body
PF: predicated region fallthrough
CT: control target
= control target key end

     0   :  { %8 = vsyncpa [#allocation4], 0  ;;  %s343_s0 = inlined_call_operand.hbm [shape: bf16[8,128], index: 0, kind: input, shape index: {}]   ;;  %s344_s1 = inlined_call_operand.hbm [shape: bf16[128,128], index: 1, kind: input, shape index: {}]   ;;  %s345_s2 = inlined_call_operand.vmem [shape: f32[1,128], index: 2, kind: input, shape index: {}]   ;;  %s346_s3 = inlined_call_operand.hbm [shape: f32[8,128], index: 3, kind: output, shape index: {}]  }
   0x1   :  { %9 = vsyncpa [#allocation7], 0 }
   0x2   :  { %10 = vsyncpa [#allocation5], 0  ;;  %s304_s12 = smov [#allocation3]   ;;  %s305_s14 = smov [#allocation6]  }
   0x3   :  { %s17_s13 = sshll.u32 %s304_s12, 4  ;;  %s26_s15 = sshll.u32 %s305_s14, 4  ;;  %s18_s13 = int_to_ptr.vmem [resolvable:$true] %s17_s13  ;;  %s27_s15 = int_to_ptr.vmem [resolvable:$true] %s26_s15 }
   0x4   :  { %s246_s16 = scalar_lea.vmem %s18_s13, 64  ;;  %p251_p1 = scmp.lt.s32.totalorder %s18_s13, %s18_s13 }
   0x5   :  { %p247_p0 = scmp.ne.s32.totalorder %s18_s13, %s246_s16  ;;  %p252_p2 = scmp.lt.s32.totalorder %s246_s16, %s246_s16 }
   0x7   :  { %p253_p3 = por %p252_p2, %p251_p1 }
   0x9   :  { %p254_p4 = pnand %p253_p3, %p247_p0 }
   0xb   :  { %257 = shalt.err (!%p254_p4)
}
   0xc   :  { %20 = dma.hbm_to_vmem [thread:$0]  %s343_s0, 64, %s18_s13, [#allocation4]  }
   0xd   :  { %s266_s19 = scalar_lea.vmem %s27_s15, 1024  ;;  %p271_p6 = scmp.lt.s32.totalorder %s27_s15, %s27_s15 }
   0xe   :  { %p267_p5 = scmp.ne.s32.totalorder %s27_s15, %s266_s19  ;;  %p272_p7 = scmp.lt.s32.totalorder %s266_s19, %s266_s19 }
  0x10   :  { %p273_p8 = por %p272_p7, %p271_p6 }
  0x12   :  { %p274_p9 = pnand %p273_p8, %p267_p5 }
  0x14   :  { %277 = shalt.err (!%p274_p9)
}
  0x15   :  { %s306_s20 = smov 64   ;;  %s307_s21 = smov 4  }
  0x16   :  { %32 = dma.hbm_to_vmem [thread:$0]  %s344_s1, 1024, %s27_s15, [#allocation7], %s306_s20, %s306_s20, %s307_s21  }
  0x17   :  { %298 = dma.done.wait [#allocation4], 64  }
  0x18   :  { %299 = vsyncadd [#allocation4], 4294967232 }
  0x19   :  { %300 = dma.done.wait [#allocation7], 1024  }
  0x1a   :  { %301 = vsyncadd [#allocation7], 4294966272  ;;  %v308_v0 = vmov 0.0   ;;  %vm309_vm0 = vmmov 0   ;;  %v230_v1 = vld [vmem:[#allocation6 + $0x38] sm:$0xff]   ;;  %v231_v2 = vld [vmem:[#allocation6 + $0x30] sm:$0xff]  }
  0x1b   :  { %203 = vmatprep.subr.bf16.mxu0 %v308_v0  ;;  %219 = vmatprep.mubr.msk.bf16.mxu0 %vm309_vm0, %v308_v0  ;;  %v232_v3 = vld [vmem:[#allocation6 + $0x28] sm:$0xff]   ;;  %v233_v4 = vld [vmem:[#allocation6 + $0x20] sm:$0xff]   ;;  %v234_v5 = vld [vmem:[#allocation6 + $0x18] sm:$0xff]   ;;  %s310_s24 = smov [#allocation8]  }
  0x1c   :  { %204 = vmatpush3.bf16.msra.mxu0 %v230_v1  ;;  %v235_v6 = vld [vmem:[#allocation6 + $0x10] sm:$0xff]   ;;  %v236_v7 = vld [vmem:[#allocation6 + $0x8] sm:$0xff]   ;;  %v237_v8 = vld [vmem:[#allocation6] sm:$0xff]   ;;  %s175_s25 = sshll.u32 %s310_s24, 4  ;;  %s176_s25 = int_to_ptr.vmem [resolvable:$true] %s175_s25 }
  0x1d   :  { %205 = vmatprep.subr.bf16.mxu0 %v308_v0  ;;  %v48_v9 = vld [vmem:[#allocation3] sm:$0xf]  ;;  %s278_s26 = scalar_lea.vmem %s176_s25, 128  ;;  %p283_p11 = scmp.lt.s32.totalorder %s176_s25, %s176_s25 }
  0x1e   :  { %v193_v10 = vld [vmem:[%s345_s2] ss:$0 sm:$0xff]  ;;  %p279_p10 = scmp.ne.s32.totalorder %s176_s25, %s278_s26  ;;  %p284_p12 = scmp.lt.s32.totalorder %s278_s26, %s278_s26 }
  0x20   :  { %206 = vmatpush3.bf16.msra.mxu0 %v231_v2  ;;  %p285_p13 = por %p284_p12, %p283_p11 }
  0x21   :  { %207 = vmatprep.subr.bf16.mxu0 %v308_v0 }
  0x22   :  { %p286_p0 = pnand %p285_p13, %p279_p10 }
  0x24   :  { %208 = vmatpush3.bf16.msra.mxu0 %v232_v3 }
  0x25   :  { %209 = vmatprep.subr.bf16.mxu0 %v308_v0 }
  0x28   :  { %210 = vmatpush3.bf16.msra.mxu0 %v233_v4 }
  0x29   :  { %211 = vmatprep.subr.bf16.mxu0 %v308_v0 }
  0x2c   :  { %212 = vmatpush3.bf16.msra.mxu0 %v234_v5 }
  0x2d   :  { %213 = vmatprep.subr.bf16.mxu0 %v308_v0 }
  0x30   :  { %214 = vmatpush3.bf16.msra.mxu0 %v235_v6 }
  0x31   :  { %215 = vmatprep.subr.bf16.mxu0 %v308_v0 }
  0x34   :  { %216 = vmatpush3.bf16.msra.mxu0 %v236_v7 }
  0x35   :  { %217 = vmatprep.subr.bf16.mxu0 %v308_v0 }
  0x38   :  { %218 = vmatpush3.bf16.msra.mxu0 %v237_v8 }
  0x3b   :  { %220 = vmatmul.mubr.bf16.vlgmr.msra.gmra.mxu0 %v48_v9 }
  0xfb   :  { %v147_v11 = vpop.f32.mrf.mxu0 }
  0xfc   :  { %v166_v12 = vadd.f32 %v193_v10, %v147_v11 }
  0xfd   :  { %v221_v13 = vpop.f32.mrf.mxu0 }
  0xfe   :  { %v167_v14 = vmax.f32 %v166_v12, 0.0 }
  0xff   :  { %v150_v15 = vpop.f32.mrf.mxu0 }
 0x100   :  { %168 = vst [vmem:[#allocation8] sm:$0xff] %v167_v14 }
 0x101   :  { %v222_v16 = vpop.f32.mrf.mxu0 }
 0x102   :  { %289 = shalt.err (!%p286_p0)
}
 0x103   :  { %178 = dma.vmem_to_hbm [thread:$0]  %s176_s25, 128, %s346_s3, [#allocation5]  }
 0x104   :  { %302 = dma.done.wait [#allocation5], 128  }
 0x105   :  { %303 = vsyncadd [#allocation5], 4294967168 }
 0x106   :  { %182 = vsyncpa [#allocation4], 1 }
 0x107   :  { %183 = vsyncpa [#allocation7], 1 }
 0x108   :  { %184 = vsyncpa [#allocation5], 1 }

</bundles_post_ra>
